<compile_context>
chip_gen: v7x
topology: tpu7x:2x2x1
jax: 0.10.0
libtpu: 0.0.40
codegen_flags: <defaults>
</compile_context>

<pallas_src>
import functools

import jax
import jax.numpy as jnp
from jax import lax
from jax.experimental import pallas as pl
from jax.experimental.pallas import tpu as pltpu


def _dyrelu_a_kernel(x_ref, w1t_ref, b1_ref, w2t_ref, b2_ref, o_ref, *,
                     k, hw_chunk, n_chunks):
    # x_ref/o_ref: (Bt, C, HWp)
    # w1t: (C, hidden) with 1/(H*W) folded in; b1: (1, hidden)
    # w2t: (hidden, 2k); b2: (1, 2k)

    # ---- per-sample dynamic coefficients (tiny serial prefix) -------------
    theta0 = jnp.sum(x_ref[...], axis=-1)                 # (Bt, C) == mean * HW
    h = jnp.dot(theta0, w1t_ref[...],
                preferred_element_type=jnp.float32) + b1_ref[...]
    h = jnp.maximum(h, 0.0)                               # (Bt, hidden)
    t = jnp.dot(h, w2t_ref[...],
                preferred_element_type=jnp.float32) + b2_ref[...]
    t = jnp.tanh(0.5 * t)                                 # == 2*sigmoid(t) - 1

    # Slot j in [0, k): slope a_j = t[:, j]   * 1.0 + (1.0 iff j == 0)
    #                   bias  b_j = t[:, k+j] * 0.5
    # Hoisted out of the HW-chunk loop; kept as (Bt, 1, 1) broadcastables.
    a_j = [t[:, j:j + 1, None] + (1.0 if j == 0 else 0.0) for j in range(k)]
    b_j = [t[:, k + j:k + j + 1, None] * 0.5 for j in range(k)]

    # ---- elementwise max over the k linear pieces, chunked over lanes -----
    def body(c, carry):
        start = pl.multiple_of(c * hw_chunk, hw_chunk)
        xc = x_ref[:, :, pl.ds(start, hw_chunk)]          # (Bt, C, hw_chunk)
        res = xc * a_j[0] + b_j[0]
        for j in range(1, k):
            res = jnp.maximum(res, xc * a_j[j] + b_j[j])
        o_ref[:, :, pl.ds(start, hw_chunk)] = res
        return carry

    lax.fori_loop(0, n_chunks, body, 0, unroll=(n_chunks <= 8))


def dyrelu_a(x, w1, b1, w2, b2, *, k=2):
    """DyReLUA forward.

    x: (B, C, H, W); w1: (hidden, C); b1: (hidden,); w2: (2k, hidden); b2: (2k,).
    """
    B, C, H, W = x.shape
    hidden = w1.shape[0]
    HW = H * W
    HWp = ((HW + 127) // 128) * 128                       # lane-dense stores

    x_flat = x.reshape(B, C, HW).astype(jnp.float32)
    if HWp != HW:
        x_flat = jnp.pad(x_flat, ((0, 0), (0, 0), (0, HWp - HW)))

    # Block batch size: cap the f32 block at ~4 MiB (double-buffered in+out
    # pipeline ~16 MiB, safe on v5e/v6e/v7x) and at 8 images per step so large
    # batches still give plenty of grid steps for pipelining / megacore split.
    bt_vmem = max(1, (4 << 20) // (4 * C * HWp))
    Bt = int(min(B, bt_vmem, 8))
    Bp = -(-B // Bt) * Bt
    if Bp != B:
        x_flat = jnp.pad(x_flat, ((0, Bp - B), (0, 0), (0, 0)))

    # Fold 1/(H*W) of the spatial mean into fc1 (kernel sums over the zero-
    # padded HWp axis, which equals the true sum).
    w1_t = (w1.T / float(HW)).astype(jnp.float32)         # (C, hidden)
    b1_2d = b1[None, :].astype(jnp.float32)               # (1, hidden)
    w2_t = w2.T.astype(jnp.float32)                       # (hidden, 2k)
    b2_2d = b2[None, :].astype(jnp.float32)               # (1, 2k)

    # Lane-chunk size: largest multiple of 128 that divides HWp (<= 2048).
    hw_chunk, m = 128, 128
    while m <= min(HWp, 2048):
        if HWp % m == 0:
            hw_chunk = m
        m += 128
    n_chunks = HWp // hw_chunk

    kernel = functools.partial(_dyrelu_a_kernel, k=k,
                               hw_chunk=hw_chunk, n_chunks=n_chunks)

    out = pl.pallas_call(
        kernel,
        out_shape=jax.ShapeDtypeStruct((Bp, C, HWp), jnp.float32),
        grid_spec=pltpu.PrefetchScalarGridSpec(
            num_scalar_prefetch=0,
            grid=(Bp // Bt,),
            in_specs=[
                pl.BlockSpec((Bt, C, HWp), lambda b: (b, 0, 0)),
                pl.BlockSpec((C, hidden), lambda b: (0, 0)),
                pl.BlockSpec((1, hidden), lambda b: (0, 0)),
                pl.BlockSpec((hidden, 2 * k), lambda b: (0, 0)),
                pl.BlockSpec((1, 2 * k), lambda b: (0, 0)),
            ],
            out_specs=pl.BlockSpec((Bt, C, HWp), lambda b: (b, 0, 0)),
        ),
        compiler_params=pltpu.CompilerParams(
            dimension_semantics=("parallel",),
            vmem_limit_bytes=32 * 1024 * 1024,
        ),
    )(x_flat, w1_t, b1_2d, w2_t, b2_2d)

    return out[:B, :, :HW].reshape(B, C, H, W).astype(x.dtype)


def dyrelu_a_reference(x, w1, b1, w2, b2, *, k=2):
    """Plain-JAX mirror of the PyTorch DyReLUA forward (NCHW, conv_type='2d')."""
    B, C, H, W = x.shape
    theta = jnp.mean(jnp.mean(x, axis=-1), axis=-1)       # (B, C)
    theta = jnp.maximum(theta @ w1.T + b1, 0.0)           # (B, hidden)
    theta = theta @ w2.T + b2                             # (B, 2k)
    theta = 2.0 * jax.nn.sigmoid(theta) - 1.0
    lambdas = jnp.array([1.0] * k + [0.5] * k, jnp.float32)
    init_v = jnp.array([1.0] + [0.0] * (2 * k - 1), jnp.float32)
    coefs = theta.reshape(-1, 2 * k) * lambdas + init_v   # (B, 2k)
    x_perm = jnp.transpose(x, (3, 1, 2, 0))[..., None]    # (W, C, H, B, 1)
    out = x_perm * coefs[:, :k] + coefs[:, k:]            # (W, C, H, B, k)
    res = jnp.max(out, axis=-1)                           # (W, C, H, B)
    return jnp.transpose(res, (3, 1, 2, 0))               # (B, C, H, W)


if __name__ == "__main__":
    B, C, H, W = 2, 8, 16, 16
    reduction, k = 4, 2
    hidden = C // reduction

    key = jax.random.PRNGKey(0)
    kx, k1, k2, k3, k4 = jax.random.split(key, 5)
    x = jax.random.normal(kx, (B, C, H, W), jnp.float32)
    w1 = jax.random.normal(k1, (hidden, C), jnp.float32) * 0.3
    b1 = jax.random.normal(k2, (hidden,), jnp.float32) * 0.1
    w2 = jax.random.normal(k3, (2 * k, hidden), jnp.float32) * 0.3
    b2 = jax.random.normal(k4, (2 * k,), jnp.float32) * 0.1

    out = dyrelu_a(x, w1, b1, w2, b2, k=k)
    out = jax.block_until_ready(out)

    ref = dyrelu_a_reference(x, w1, b1, w2, b2, k=k)
    assert out.shape == (B, C, H, W)
    assert jnp.allclose(out, ref, atol=1e-5, rtol=1e-5), "mismatch vs reference"

    print("KERNEL_OK")
</pallas_src>

<mosaic_0001>
module attributes {stable_mosaic.version = 11 : i64} {
  func.func @_dyrelu_a_kernel(%arg0: i32, %arg1: memref<2x8x256xf32, #tpu.memory_space<vmem>>, %arg2: memref<8x2xf32, #tpu.memory_space<vmem>>, %arg3: memref<1x2xf32, #tpu.memory_space<vmem>>, %arg4: memref<2x4xf32, #tpu.memory_space<vmem>>, %arg5: memref<1x4xf32, #tpu.memory_space<vmem>>, %arg6: memref<2x8x256xf32, #tpu.memory_space<vmem>>) attributes {dimension_semantics = [#tpu.dimension_semantics<parallel>], iteration_bounds = array<i64: 1>, scalar_prefetch = 0 : i64, scratch_operands = 0 : i64, tpu.core_type = #tpu.core_type<tc>, window_params = [{transform_indices = @transform_0, window_bounds = array<i64: 2, 8, 256>}, {pipeline_mode = #tpu.pipeline_mode<synchronous>, transform_indices = @transform_1, window_bounds = array<i64: 8, 2>}, {pipeline_mode = #tpu.pipeline_mode<synchronous>, transform_indices = @transform_2, window_bounds = array<i64: 1, 2>}, {pipeline_mode = #tpu.pipeline_mode<synchronous>, transform_indices = @transform_3, window_bounds = array<i64: 2, 4>}, {pipeline_mode = #tpu.pipeline_mode<synchronous>, transform_indices = @transform_4, window_bounds = array<i64: 1, 4>}, {transform_indices = @transform_5, window_bounds = array<i64: 2, 8, 256>}]} {
    %c0 = arith.constant 0 : index
    %c0_0 = arith.constant 0 : index
    %c0_1 = arith.constant 0 : index
    %0 = vector.load %arg1[%c0, %c0_0, %c0_1] : memref<2x8x256xf32, #tpu.memory_space<vmem>>, vector<2x8x256xf32>
    %cst = arith.constant dense<0.000000e+00> : vector<2x8xf32>
    %1 = vector.multi_reduction <add>, %0, %cst [2] : vector<2x8x256xf32> to vector<2x8xf32>
    %c0_2 = arith.constant 0 : index
    %c0_3 = arith.constant 0 : index
    %2 = vector.load %arg2[%c0_2, %c0_3] : memref<8x2xf32, #tpu.memory_space<vmem>>, vector<8x2xf32>
    %cst_4 = arith.constant dense<0.000000e+00> : vector<2x2xf32>
    %3 = tpu.matmul %1, %2, %cst_4 {dimension_numbers = #tpu.dot_dimension_numbers<[1], [0], [0], [1], [0, 0, 1, 1], [], []>} : vector<2x8xf32>, vector<8x2xf32>, vector<2x2xf32> -> vector<2x2xf32>
    %c0_5 = arith.constant 0 : index
    %c0_6 = arith.constant 0 : index
    %4 = vector.load %arg3[%c0_5, %c0_6] : memref<1x2xf32, #tpu.memory_space<vmem>>, vector<1x2xf32>
    %5 = vector.broadcast %4 : vector<1x2xf32> to vector<2x2xf32>
    %6 = arith.addf %3, %5 : vector<2x2xf32>
    %cst_7 = arith.constant 0.000000e+00 : f32
    %7 = vector.broadcast %cst_7 : f32 to vector<2x2xf32>
    %8 = arith.maximumf %6, %7 : vector<2x2xf32>
    %c0_8 = arith.constant 0 : index
    %c0_9 = arith.constant 0 : index
    %9 = vector.load %arg4[%c0_8, %c0_9] : memref<2x4xf32, #tpu.memory_space<vmem>>, vector<2x4xf32>
    %cst_10 = arith.constant dense<0.000000e+00> : vector<2x4xf32>
    %10 = tpu.matmul %8, %9, %cst_10 {dimension_numbers = #tpu.dot_dimension_numbers<[1], [0], [0], [1], [0, 0, 1, 1], [], []>} : vector<2x2xf32>, vector<2x4xf32>, vector<2x4xf32> -> vector<2x4xf32>
    %c0_11 = arith.constant 0 : index
    %c0_12 = arith.constant 0 : index
    %11 = vector.load %arg5[%c0_11, %c0_12] : memref<1x4xf32, #tpu.memory_space<vmem>>, vector<1x4xf32>
    %12 = vector.broadcast %11 : vector<1x4xf32> to vector<2x4xf32>
    %13 = arith.addf %10, %12 : vector<2x4xf32>
    %cst_13 = arith.constant 5.000000e-01 : f32
    %14 = vector.broadcast %cst_13 : f32 to vector<2x4xf32>
    %15 = arith.mulf %14, %13 : vector<2x4xf32>
    %16 = math.tanh %15 : vector<2x4xf32>
    %17 = vector.extract_strided_slice %16 {offsets = [0, 0], sizes = [2, 1], strides = [1, 1]} : vector<2x4xf32> to vector<2x1xf32>
    %18 = vector.shape_cast %17 : vector<2x1xf32> to vector<2x1x1xf32>
    %cst_14 = arith.constant 1.000000e+00 : f32
    %19 = vector.broadcast %cst_14 : f32 to vector<2x1x1xf32>
    %20 = arith.addf %18, %19 : vector<2x1x1xf32>
    %21 = vector.extract_strided_slice %16 {offsets = [0, 1], sizes = [2, 1], strides = [1, 1]} : vector<2x4xf32> to vector<2x1xf32>
    %22 = vector.shape_cast %21 : vector<2x1xf32> to vector<2x1x1xf32>
    %cst_15 = arith.constant 0.000000e+00 : f32
    %23 = vector.broadcast %cst_15 : f32 to vector<2x1x1xf32>
    %24 = arith.addf %22, %23 : vector<2x1x1xf32>
    %25 = vector.extract_strided_slice %16 {offsets = [0, 2], sizes = [2, 1], strides = [1, 1]} : vector<2x4xf32> to vector<2x1xf32>
    %26 = vector.shape_cast %25 : vector<2x1xf32> to vector<2x1x1xf32>
    %cst_16 = arith.constant 5.000000e-01 : f32
    %27 = vector.broadcast %cst_16 : f32 to vector<2x1x1xf32>
    %28 = arith.mulf %26, %27 : vector<2x1x1xf32>
    %29 = vector.extract_strided_slice %16 {offsets = [0, 3], sizes = [2, 1], strides = [1, 1]} : vector<2x4xf32> to vector<2x1xf32>
    %30 = vector.shape_cast %29 : vector<2x1xf32> to vector<2x1x1xf32>
    %cst_17 = arith.constant 5.000000e-01 : f32
    %31 = vector.broadcast %cst_17 : f32 to vector<2x1x1xf32>
    %32 = arith.mulf %30, %31 : vector<2x1x1xf32>
    %c0_i32 = arith.constant 0 : i32
    %c256_i32 = arith.constant 256 : i32
    %33 = arith.muli %c0_i32, %c256_i32 : i32
    %34 = tpu.assume_multiple %33, 256 : i32
    %c0_18 = arith.constant 0 : index
    %c0_19 = arith.constant 0 : index
    %35 = arith.index_cast %34 : i32 to index
    %36 = vector.load %arg1[%c0_18, %c0_19, %35] : memref<2x8x256xf32, #tpu.memory_space<vmem>>, vector<2x8x256xf32>
    %37 = vector.broadcast %20 : vector<2x1x1xf32> to vector<2x8x256xf32>
    %38 = arith.mulf %36, %37 : vector<2x8x256xf32>
    %39 = vector.broadcast %28 : vector<2x1x1xf32> to vector<2x8x256xf32>
    %40 = arith.addf %38, %39 : vector<2x8x256xf32>
    %41 = vector.broadcast %24 : vector<2x1x1xf32> to vector<2x8x256xf32>
    %42 = arith.mulf %36, %41 : vector<2x8x256xf32>
    %43 = vector.broadcast %32 : vector<2x1x1xf32> to vector<2x8x256xf32>
    %44 = arith.addf %42, %43 : vector<2x8x256xf32>
    %45 = arith.maximumf %40, %44 : vector<2x8x256xf32>
    %c0_20 = arith.constant 0 : index
    %c0_21 = arith.constant 0 : index
    %46 = arith.index_cast %34 : i32 to index
    %47 = vector.load %arg6[%c0_20, %c0_21, %46] : memref<2x8x256xf32, #tpu.memory_space<vmem>>, vector<2x8x256xf32>
    tpu.vector_store %arg6[%c0_20, %c0_21, %46], %45 {strides = array<i32>} : memref<2x8x256xf32, #tpu.memory_space<vmem>>, vector<2x8x256xf32>,
    %c1_i32 = arith.constant 1 : i32
    return
  }
  func.func @transform_0(%arg0: i32) -> (i32, i32, i32) {
    %c0_i32 = arith.constant 0 : i32
    %c0_i32_0 = arith.constant 0 : i32
    %c0_i32_1 = arith.constant 0 : i32
    return %arg0, %c0_i32, %c0_i32_0 : i32, i32, i32
  }
  func.func @transform_1(%arg0: i32) -> (i32, i32) {
    %c0_i32 = arith.constant 0 : i32
    %c0_i32_0 = arith.constant 0 : i32
    %c0_i32_1 = arith.constant 0 : i32
    return %c0_i32, %c0_i32_0 : i32, i32
  }
  func.func @transform_2(%arg0: i32) -> (i32, i32) {
    %c0_i32 = arith.constant 0 : i32
    %c0_i32_0 = arith.constant 0 : i32
    %c0_i32_1 = arith.constant 0 : i32
    return %c0_i32, %c0_i32_0 : i32, i32
  }
  func.func @transform_3(%arg0: i32) -> (i32, i32) {
    %c0_i32 = arith.constant 0 : i32
    %c0_i32_0 = arith.constant 0 : i32
    %c0_i32_1 = arith.constant 0 : i32
    return %c0_i32, %c0_i32_0 : i32, i32
  }
  func.func @transform_4(%arg0: i32) -> (i32, i32) {
    %c0_i32 = arith.constant 0 : i32
    %c0_i32_0 = arith.constant 0 : i32
    %c0_i32_1 = arith.constant 0 : i32
    return %c0_i32, %c0_i32_0 : i32, i32
  }
  func.func @transform_5(%arg0: i32) -> (i32, i32, i32) {
    %c0_i32 = arith.constant 0 : i32
    %c0_i32_0 = arith.constant 0 : i32
    %c0_i32_1 = arith.constant 0 : i32
    return %arg0, %c0_i32, %c0_i32_0 : i32, i32, i32
  }
}

</mosaic_0001>

<bundles_post_ra>
// kernel: tpu_custom_call.1
= control target key start
LH: loop header
LB: loop body
LE: loop exit
PB: predicated region body
PF: predicated region fallthrough
CT: control target
= control target key end

     0   :  { %10 = vsyncpa [#allocation3], 0  ;;  %s559_s0 = inlined_call_operand.hbm [shape: f32[2,8,256], index: 0, kind: input, shape index: {}]   ;;  %s560_s1 = inlined_call_operand.vmem [shape: f32[8,2], index: 1, kind: input, shape index: {}]   ;;  %s561_s2 = inlined_call_operand.vmem [shape: f32[1,2], index: 2, kind: input, shape index: {}]   ;;  %s562_s3 = inlined_call_operand.vmem [shape: f32[2,4], index: 3, kind: input, shape index: {}]   ;;  %s563_s4 = inlined_call_operand.vmem [shape: f32[1,4], index: 4, kind: input, shape index: {}]   ;;  %s564_s5 = inlined_call_operand.hbm [shape: f32[2,8,256], index: 5, kind: output, shape index: {}]  }
   0x1   :  { %11 = vsyncpa [#allocation4], 0  ;;  %s456_s18 = smov [#allocation2]   ;;  %s408_s22 = scalar_lea.hbm %s559_s0, 512 }
   0x2   :  { %s17_s19 = sshll.u32 %s456_s18, 4  ;;  %p409_p0 = scmp.ne.s32.totalorder %s559_s0, %s408_s22  ;;  %s18_s19 = int_to_ptr.vmem [resolvable:$true] %s17_s19 }
   0x3   :  { %p412_p1 = scmp.lt.u32.totalorder %s408_s22, %s559_s0 }
   0x5   :  { %p414_p2 = pnand %p412_p1, %p409_p0 }
   0x7   :  { %417 = shalt.err (!%p414_p2)
}
   0x8   :  { %s418_s27 = scalar_lea.vmem %s18_s19, 512  ;;  %p423_p4 = scmp.lt.s32.totalorder %s18_s19, %s18_s19 }
   0x9   :  { %p419_p3 = scmp.ne.s32.totalorder %s18_s19, %s418_s27  ;;  %p424_p5 = scmp.lt.s32.totalorder %s418_s27, %s418_s27 }
   0xb   :  { %p425_p6 = por %p424_p5, %p423_p4 }
   0xd   :  { %p426_p7 = pnand %p425_p6, %p419_p3 }
   0xf   :  { %429 = shalt.err (!%p426_p7)
}
  0x10   :  { %s457_s28 = smov 256   ;;  %s458_s29 = smov 16  }
  0x11   :  { %23 = dma.hbm_to_vmem [thread:$0]  %s559_s0, 512, %s18_s19, [#allocation3], %s457_s28, %s457_s28, %s458_s29  }
  0x12   :  { %452 = dma.done.wait [#allocation3], 512  }
  0x13   :  { %453 = vsyncadd [#allocation3], 4294966784  ;;  %v512_v0 = vld [vmem:[#allocation2] sm:$0xff]  ;;  %v514_v1 = vld [vmem:[#allocation2 + $0x8] sm:$0xff]  ;;  %v459_v7 = vmov 0.0   ;;  %vm460_vm0 = vmmov 0   ;;  %v55_v8 = vlaneseq }
  0x14   :  { %v516_v2 = vld [vmem:[#allocation2 + $0x10] sm:$0xff]  ;;  %v39_v3 = vadd.f32 %v514_v1, %v512_v0  ;;  %v520_v4 = vld [vmem:[#allocation2 + $0x18] sm:$0xff]  ;;  %v45_v6 = vld [vmem:[%s560_s1] sm:$0xff]  ;;  %376 = vmatprep.subr.mxu0 %v459_v7  ;;  %378 = vmatprep.mubr.msk.f32.mxu0 %vm460_vm0, %v459_v7  ;;  %vm65_vm1 = vcmask 1041409   ;;  %vm67_vm2 = vcmask 64512   ;;  %vm153_vm3 = vcmask 1041408  }
  0x15   :  { %v42_v5 = vadd.f32 %v520_v4, %v516_v2  ;;  %377 = vmatpush3.msra.mxu0 %v45_v6  ;;  %381 = vmatprep.subr.mxu1 %v459_v7  ;;  %v56_v9 = vand.u32 127, %v55_v8  ;;  %v58_v10 = vshrl.u32 %v55_v8, 7  ;;  %v141_v17 = vld [vmem:[%s562_s3] sm:$0x3]  ;;  %vm149_vm4 = vcmask 15360  }
  0x16   :  { %40 = vadd.xlane.f32.xlu0 %v39_v3  ;;  %383 = vmatprep.mubr.msk.f32.mxu1 %vm460_vm0, %v459_v7  ;;  %v367_v18 = vld [vmem:[%s561_s2] ss:$0 sm:$0xff]  ;;  %v461_v23 = vmov 1   ;;  %v462_v24 = vmov 0   ;;  %v463_v30 = vmov 1966171168  }
  0x17   :  { %v59_v12 = vsub.s32 %v56_v9, %v58_v10  ;;  %382 = vmatpush3.msk.msra.mxu1 %vm153_vm3, %v141_v17  ;;  %398 = vset.pattern.permute.xlu0 %v461_v23  ;;  %v369_v25 = vld [vmem:[%s563_s4] ss:$0 sm:$0xff]  ;;  %v231_v31 = vunpack.c.l.s4 %v463_v30  ;;  %v268_v35 = vsub.s32 0, %v58_v10  ;;  %v464_v50 = vmov 3   ;;  %s466_s2 = smov [#allocation5]  }
  0x18   :  { %397 = vset.pattern.permute.xlu1 %v462_v24  ;;  %v465_v51 = vmov 2   ;;  %s355_s3 = sshll.u32 %s466_s2, 4  ;;  %s356_s3 = int_to_ptr.vmem [resolvable:$true] %s355_s3 }
  0x19   :  { %v232_v32 = vunpack.c.0.s8 %v231_v31  ;;  %s430_s4 = scalar_lea.vmem %s356_s3, 512  ;;  %p435_p9 = scmp.lt.s32.totalorder %s356_s3, %s356_s3 }
  0x1a   :  { %43 = vadd.xlane.f32.xlu0 %v42_v5  ;;  %p431_p8 = scmp.ne.s32.totalorder %s356_s3, %s430_s4  ;;  %p436_p10 = scmp.lt.s32.totalorder %s430_s4, %s430_s4 }
  0x1b   :  { %v235_v33 = vsub.s32 %v232_v32, %v58_v10 }
  0x1c   :  { %p437_p11 = por %p436_p10, %p435_p9 }
  0x1e   :  { %p438_p12 = pnand %p437_p11, %p431_p8 }
  0xa3   :  { %v41_v11 = vpop.xlane.xlu0 %40 }
  0xa4   :  { %v60_v14 = vrot.slane %v41_v11, %v59_v12 }
  0xa7   :  { %v44_v13 = vpop.xlane.xlu0 %43 }
  0xa8   :  { %v64_v15 = vrot.slane %v44_v13, %v59_v12 }
  0xaa   :  { %v66_v16 = vsel %vm65_vm1, %v64_v15, %v60_v14 }
  0xab   :  { %379 = vmatmul.mubr.msk.f32.vlgmr.msra.gmra.mrb[0].mxu0 %vm67_vm2, %v66_v16 }
 0x17e   :  { %v136_v19 = vpop.f32.mrb[0].mxu0 }
 0x17f   :  { %v137_v20 = vadd.f32 %v367_v18, %v136_v19  ;;  %v380_v21 = vpop.f32.mrb[1].mxu0 }
 0x181   :  { %v140_v22 = vmax.f32 %v137_v20, 0.0 }
 0x183   :  { %384 = vmatmul.mubr.msk.f32.vlgmr.msra.gmra.mrb[0].mxu1 %vm149_vm4, %v140_v22 }
 0x256   :  { %v223_v26 = vpop.f32.mrb[0].mxu1 }
 0x257   :  { %v224_v27 = vadd.f32 %v369_v25, %v223_v26  ;;  %v385_v28 = vpop.f32.mrb[1].mxu1 }
 0x259   :  { %v227_v29 = vmul.f32 0.5, %v224_v27 }
 0x25b   :  { %406 = vtanh.f32 %v227_v29 }
 0x265   :  { %v407_v34 = vpop.eup %406 }
 0x266   :  { %v236_v36 = vrot.slane %v407_v34, %v235_v33 }
 0x268   :  { %v244_v37 = vrot.slane %v236_v36, %v235_v33  ;;  %v237_v38 = vcombine.high %v236_v36, %v236_v36 }
 0x26a   :  { %v313_v39 = vrot.slane %v244_v37, %v268_v35  ;;  %v254_v40 = vadd.f32 1.0, %v244_v37  ;;  %v251_v41 = vrot.slane %v237_v38, %v235_v33  ;;  %v258_v42 = vmul.f32 0.5, %v244_v37 }
 0x26c   :  { %319 = vperm.xlu0 %398, %v313_v39   ;;  %v269_v43 = vrot.slane %v254_v40, %v268_v35  ;;  %v317_v44 = vrot.slane %v251_v41, %v268_v35  ;;  %v291_v45 = vrot.slane %v258_v42, %v268_v35  ;;  %v255_v46 = vadd.f32 1.0, %v251_v41 }
 0x26d   :  { %v259_v47 = vmul.f32 0.5, %v251_v41 }
 0x26e   :  { %275 = vperm.xlu1 %397, %v269_v43   ;;  %v273_v48 = vrot.slane %v255_v46, %v268_v35 }
 0x26f   :  { %v295_v49 = vrot.slane %v259_v47, %v268_v35 }
 0x270   :  { %405 = vset.pattern.permute.xlu0 %v464_v50 }
 0x272   :  { %399 = vset.pattern.permute.xlu1 %v461_v23 }
 0x273   :  { %323 = vperm.xlu1 %399, %v317_v44  }
 0x277   :  { %400 = vset.pattern.permute.xlu1 %v465_v51 }
 0x278   :  { %297 = vperm.xlu1 %400, %v291_v45  }
 0x27c   :  { %401 = vset.pattern.permute.xlu1 %v464_v50 }
 0x27d   :  { %331 = vperm.xlu1 %401, %v291_v45  }
 0x281   :  { %402 = vset.pattern.permute.xlu1 %v462_v24 }
 0x282   :  { %279 = vperm.xlu1 %402, %v273_v48  }
 0x286   :  { %403 = vset.pattern.permute.xlu1 %v465_v51 }
 0x287   :  { %301 = vperm.xlu1 %403, %v295_v49  }
 0x28b   :  { %404 = vset.pattern.permute.xlu1 %v464_v50 }
 0x28c   :  { %335 = vperm.xlu1 %404, %v295_v49  }
 0x2eb   :  { %v320_v55 = vpop.permute.xlu0 %319 }
 0x2ec   :  { %v326_v56 = vmul.f32 %v320_v55, %v512_v0  ;;  %v327_v57 = vmul.f32 %v320_v55, %v514_v1 }
 0x2ed   :  { %v276_v52 = vpop.permute.xlu1 %275 }
 0x2ee   :  { %v282_v58 = vmul.f32 %v276_v52, %v512_v0  ;;  %v283_v59 = vmul.f32 %v276_v52, %v514_v1 }
 0x2f2   :  { %v324_v53 = vpop.permute.xlu1 %323 }
 0x2f3   :  { %v328_v9 = vmul.f32 %v324_v53, %v516_v2  ;;  %v329_v10 = vmul.f32 %v324_v53, %v520_v4 }
 0x2f7   :  { %v298_v54 = vpop.permute.xlu1 %297 }
 0x2f8   :  { %v304_v61 = vadd.f32 %v298_v54, %v282_v58  ;;  %v305_v62 = vadd.f32 %v298_v54, %v283_v59 }
 0x2fc   :  { %v332_v60 = vpop.permute.xlu1 %331 }
 0x2fd   :  { %v338_v63 = vadd.f32 %v332_v60, %v326_v56  ;;  %v339_v3 = vadd.f32 %v332_v60, %v327_v57 }
 0x2ff   :  { %v342_v5 = vmax.f32 %v304_v61, %v338_v63  ;;  %v343_v6 = vmax.f32 %v305_v62, %v339_v3 }
 0x301   :  { %346 = vst [vmem:[#allocation5] sm:$0xff] %v342_v5  ;;  %347 = vst [vmem:[#allocation5 + $0x8] sm:$0xff] %v343_v6  ;;  %v280_v7 = vpop.permute.xlu1 %279 }
 0x302   :  { %v284_v11 = vmul.f32 %v280_v7, %v516_v2  ;;  %v285_v0 = vmul.f32 %v280_v7, %v520_v4 }
 0x306   :  { %v302_v8 = vpop.permute.xlu1 %301 }
 0x307   :  { %v306_v12 = vadd.f32 %v302_v8, %v284_v11  ;;  %v307_v13 = vadd.f32 %v302_v8, %v285_v0 }
 0x30b   :  { %v336_v1 = vpop.permute.xlu1 %335 }
 0x30c   :  { %v340_v14 = vadd.f32 %v336_v1, %v328_v9  ;;  %v341_v15 = vadd.f32 %v336_v1, %v329_v10 }
 0x30e   :  { %v344_v16 = vmax.f32 %v306_v12, %v340_v14  ;;  %v345_v17 = vmax.f32 %v307_v13, %v341_v15 }
 0x310   :  { %348 = vst [vmem:[#allocation5 + $0x10] sm:$0xff] %v344_v16  ;;  %349 = vst [vmem:[#allocation5 + $0x18] sm:$0xff] %v345_v17 }
 0x311   :  { %441 = shalt.err (!%p438_p12)
}
 0x312   :  { %s442_s15 = scalar_lea.hbm %s564_s5, 512 }
 0x313   :  { %p443_p13 = scmp.ne.s32.totalorder %s564_s5, %s442_s15  ;;  %p446_p0 = scmp.lt.u32.totalorder %s442_s15, %s564_s5 }
 0x315   :  { %p448_p1 = pnand %p446_p0, %p443_p13 }
 0x317   :  { %451 = shalt.err (!%p448_p1)
}
 0x318   :  { %361 = dma.vmem_to_hbm [thread:$0]  %s356_s3, 512, %s564_s5, [#allocation4], %s457_s28, %s457_s28, %s458_s29  }
 0x319   :  { %454 = dma.done.wait [#allocation4], 512  }
 0x31a   :  { %455 = vsyncadd [#allocation4], 4294966784 }
 0x31b   :  { %365 = vsyncpa [#allocation3], 1 }
 0x31c   :  { %366 = vsyncpa [#allocation4], 1 }

</bundles_post_ra>
